<compile_context>
chip_gen: v7x
topology: tpu7x:2x2x1
jax: 0.10.0
libtpu: 0.0.40
codegen_flags: <defaults>
</compile_context>

<pallas_src>
import functools

import jax
import jax.numpy as jnp
from jax import lax
from jax.experimental import pallas as pl
from jax.experimental.pallas import tpu as pltpu


def _dcl_kernel(z1_row_ref, z2_row_ref, z1_col_ref, z2_col_ref,   # inputs
                out_ref,                                          # output
                m_ref, l_ref,                                     # scratch
                *, inv_temperature, n_valid, tm, tk, n_col_blocks,
                needs_col_mask, matmul_dtype):
    i = pl.program_id(0)          # row-block index ("parallel")
    k = pl.program_id(1)          # column-block index ("arbitrary" reduction)

    @pl.when(k == 0)
    def _init():
        m_ref[...] = jnp.full_like(m_ref, -jnp.inf)
        l_ref[...] = jnp.zeros_like(l_ref)

    # Fold 1/T into the LHS rows once; both matmuls and the positive diagonal
    # inherit the scale (TM*D mult << 2*TM*TK*D MACs of the matmuls below).
    a = z1_row_ref[...].astype(jnp.float32) * jnp.float32(inv_temperature)

    lhs = a.astype(matmul_dtype)
    self_cols = z1_col_ref[...].astype(matmul_dtype)     # (TK, D)
    cross_cols = z2_col_ref[...].astype(matmul_dtype)    # (TK, D)

    # NT contraction: A @ B.T without materializing a transpose.
    nt = (((1,), (1,)), ((), ()))
    s_self = lax.dot_general(lhs, self_cols, dimension_numbers=nt,
                             preferred_element_type=jnp.float32)   # (TM, TK)
    s_cross = lax.dot_general(lhs, cross_cols, dimension_numbers=nt,
                              preferred_element_type=jnp.float32)  # (TM, TK)

    row_g = i * tm + lax.broadcasted_iota(jnp.int32, (tm, tk), 0)
    col_g = k * tk + lax.broadcasted_iota(jnp.int32, (tm, tk), 1)

    # Faithful to the module: neg_mask (eye repeated twice) * finfo(f32).eps is
    # added on the diagonal of BOTH halves (cheap compare+select, no eye matmul).
    eps = jnp.float32(jnp.finfo(jnp.float32).eps)
    diag_bump = jnp.where(row_g == col_g, eps, jnp.float32(0.0))
    s_self = s_self + diag_bump
    s_cross = s_cross + diag_bump

    if needs_col_mask:  # static: only emitted when N was padded to a tile multiple
        col_ok = col_g < n_valid
        ninf = jnp.float32(-jnp.inf)
        s_self = jnp.where(col_ok, s_self, ninf)
        s_cross = jnp.where(col_ok, s_cross, ninf)

    # Online logsumexp over the concatenation [self_sim, cross] without concat.
    blk_max = jnp.maximum(jnp.max(s_self, axis=1, keepdims=True),
                          jnp.max(s_cross, axis=1, keepdims=True))
    m_prev = m_ref[...]
    m_new = jnp.maximum(m_prev, blk_max)
    alpha = jnp.exp(m_prev - m_new)
    p_sum = (jnp.sum(jnp.exp(s_self - m_new), axis=1, keepdims=True)
             + jnp.sum(jnp.exp(s_cross - m_new), axis=1, keepdims=True))
    l_ref[...] = alpha * l_ref[...] + p_sum
    m_ref[...] = m_new

    @pl.when(k == n_col_blocks - 1)
    def _finalize():
        # positive term: -diag(z1 @ z2.T)/T  ==  -sum((z1/T) * z2, axis=1)
        diag = jnp.sum(a * z2_row_ref[...].astype(jnp.float32),
                       axis=1, keepdims=True)                     # (TM, 1)
        out_ref[...] = -diag + jnp.log(l_ref[...]) + m_ref[...]


def _round_up(x: int, m: int) -> int:
    return (x + m - 1) // m * m


def decoupled_contrastive_loss(z1: jax.Array, z2: jax.Array,
                               temperature: float = 0.1,
                               *, block: int | None = None,
                               matmul_dtype=jnp.float32) -> jax.Array:
    """One-way DCL loss (weight_fn=None), tiled Pallas kernel.

    `matmul_dtype=jnp.bfloat16` is an optional fast path for v6e/v7x MXUs
    (f32 accumulation is kept); default stays f32 for bit-faithful results.
    """
    assert z1.shape == z2.shape and z1.ndim == 2
    n, d = z1.shape

    # Tile size: multiple of 8 (sublane), capped at 128; rows == cols so one
    # padded size divides both grid axes.
    t = block if block is not None else min(128, _round_up(n, 8))
    assert t % 8 == 0
    n_pad = _round_up(n, t)

    if n_pad != n:
        pad = n_pad - n
        z1p = jnp.pad(z1, ((0, pad), (0, 0)))
        z2p = jnp.pad(z2, ((0, pad), (0, 0)))
    else:
        z1p, z2p = z1, z2

    n_row_blocks = n_pad // t
    n_col_blocks = n_pad // t

    kernel = functools.partial(
        _dcl_kernel,
        inv_temperature=float(1.0 / temperature),
        n_valid=n, tm=t, tk=t, n_col_blocks=n_col_blocks,
        needs_col_mask=(n_pad != n), matmul_dtype=matmul_dtype)

    row_spec = pl.BlockSpec((t, d), lambda i, k: (i, 0))
    col_spec = pl.BlockSpec((t, d), lambda i, k: (k, 0))

    per_row = pl.pallas_call(
        kernel,
        out_shape=jax.ShapeDtypeStruct((n_pad, 1), jnp.float32),
        grid_spec=pltpu.PrefetchScalarGridSpec(
            num_scalar_prefetch=0,
            grid=(n_row_blocks, n_col_blocks),
            in_specs=[row_spec,   # z1 row block   (LHS of both matmuls)
                      row_spec,   # z2 row block   (positive diagonal)
                      col_spec,   # z1 column block (self similarity RHS)
                      col_spec],  # z2 column block (cross view RHS)
            out_specs=pl.BlockSpec((t, 1), lambda i, k: (i, 0)),
            scratch_shapes=[pltpu.VMEM((t, 1), jnp.float32),   # running max m
                            pltpu.VMEM((t, 1), jnp.float32)],  # running sum l
        ),
        compiler_params=pltpu.CompilerParams(
            dimension_semantics=("parallel", "arbitrary")),
    )(z1p, z2p, z1p, z2p)

    # Drop padded rows, then mean (tiny XLA epilogue).
    return jnp.mean(per_row[:n, 0])


def _reference_loss(z1, z2, temperature=0.1):
    """Pure-JAX reference mirroring the PyTorch forward exactly."""
    cross = z1 @ z2.T
    positive_loss = -jnp.diag(cross) / temperature
    neg_similarity = jnp.concatenate([z1 @ z1.T, cross], axis=1) / temperature
    neg_mask = jnp.tile(jnp.eye(z1.shape[0], dtype=z1.dtype), (1, 2))
    eps = jnp.finfo(z1.dtype).eps
    negative_loss = jax.scipy.special.logsumexp(
        neg_similarity + neg_mask * eps, axis=1)
    return jnp.mean(positive_loss + negative_loss)


if __name__ == "__main__":
    key = jax.random.PRNGKey(0)
    k1, k2 = jax.random.split(key)

    # Small, deterministic test cases: one tiny (single tile) and one that
    # exercises multi-block tiling plus row/column padding (200 % 128 != 0).
    for (n, d) in [(8, 32), (200, 96)]:
        z1 = jax.random.normal(k1, (n, d), dtype=jnp.float32)
        z2 = jax.random.normal(k2, (n, d), dtype=jnp.float32)
        # L2-normalize like typical contrastive embeddings (not required).
        z1 = z1 / jnp.linalg.norm(z1, axis=1, keepdims=True)
        z2 = z2 / jnp.linalg.norm(z2, axis=1, keepdims=True)

        loss = decoupled_contrastive_loss(z1, z2, temperature=0.1)
        jax.block_until_ready(loss)

        ref = _reference_loss(z1, z2, temperature=0.1)
        assert jnp.allclose(loss, ref, atol=1e-4, rtol=1e-4), (n, d, loss, ref)

    print("KERNEL_OK")
</pallas_src>

<mosaic_0001>
module attributes {stable_mosaic.version = 11 : i64} {
  func.func @_dcl_kernel(%arg0: i32, %arg1: i32, %arg2: memref<8x32xf32, #tpu.memory_space<vmem>>, %arg3: memref<8x32xf32, #tpu.memory_space<vmem>>, %arg4: memref<8x32xf32, #tpu.memory_space<vmem>>, %arg5: memref<8x32xf32, #tpu.memory_space<vmem>>, %arg6: memref<8x1xf32, #tpu.memory_space<vmem>>, %arg7: memref<8x1xf32, #tpu.memory_space<vmem>>, %arg8: memref<8x1xf32, #tpu.memory_space<vmem>>) attributes {dimension_semantics = [#tpu.dimension_semantics<parallel>, #tpu.dimension_semantics<arbitrary>], iteration_bounds = array<i64: 1, 1>, scalar_prefetch = 0 : i64, scratch_operands = 2 : i64, tpu.core_type = #tpu.core_type<tc>, window_params = [{transform_indices = @transform_0, window_bounds = array<i64: 8, 32>}, {transform_indices = @transform_1, window_bounds = array<i64: 8, 32>}, {transform_indices = @transform_2, window_bounds = array<i64: 8, 32>}, {transform_indices = @transform_3, window_bounds = array<i64: 8, 32>}, {transform_indices = @transform_4, window_bounds = array<i64: 8, 1>}]} {
    %c0_i32 = arith.constant 0 : i32
    %0 = arith.cmpi eq, %arg1, %c0_i32 : i32
    %1 = arith.extui %0 : i1 to i32
    %c0_i32_0 = arith.constant 0 : i32
    %2 = arith.cmpi ne, %1, %c0_i32_0 : i32
    scf.if %2 {
      %cst_25 = arith.constant 0xFF800000 : f32
      %52 = vector.broadcast %cst_25 : f32 to vector<8x1xf32>
      %c0_26 = arith.constant 0 : index
      %c0_27 = arith.constant 0 : index
      %53 = vector.load %arg7[%c0_26, %c0_27] : memref<8x1xf32, #tpu.memory_space<vmem>>, vector<8x1xf32>
      tpu.vector_store %arg7[%c0_26, %c0_27], %52 {strides = array<i32>} : memref<8x1xf32, #tpu.memory_space<vmem>>, vector<8x1xf32>,
      %cst_28 = arith.constant 0.000000e+00 : f32
      %54 = vector.broadcast %cst_28 : f32 to vector<8x1xf32>
      %c0_29 = arith.constant 0 : index
      %c0_30 = arith.constant 0 : index
      %55 = vector.load %arg8[%c0_29, %c0_30] : memref<8x1xf32, #tpu.memory_space<vmem>>, vector<8x1xf32>
      tpu.vector_store %arg8[%c0_29, %c0_30], %54 {strides = array<i32>} : memref<8x1xf32, #tpu.memory_space<vmem>>, vector<8x1xf32>,
    } else {
    }
    %c0 = arith.constant 0 : index
    %c0_1 = arith.constant 0 : index
    %3 = vector.load %arg2[%c0, %c0_1] : memref<8x32xf32, #tpu.memory_space<vmem>>, vector<8x32xf32>
    %cst = arith.constant 1.000000e+01 : f32
    %4 = vector.broadcast %cst : f32 to vector<8x32xf32>
    %5 = arith.mulf %3, %4 : vector<8x32xf32>
    %c0_2 = arith.constant 0 : index
    %c0_3 = arith.constant 0 : index
    %6 = vector.load %arg4[%c0_2, %c0_3] : memref<8x32xf32, #tpu.memory_space<vmem>>, vector<8x32xf32>
    %c0_4 = arith.constant 0 : index
    %c0_5 = arith.constant 0 : index
    %7 = vector.load %arg5[%c0_4, %c0_5] : memref<8x32xf32, #tpu.memory_space<vmem>>, vector<8x32xf32>
    %cst_6 = arith.constant dense<0.000000e+00> : vector<8x8xf32>
    %8 = tpu.matmul %5, %6, %cst_6 {dimension_numbers = #tpu.dot_dimension_numbers<[1], [1], [0], [0], [0, 0, 1, 0], [], []>} : vector<8x32xf32>, vector<8x32xf32>, vector<8x8xf32> -> vector<8x8xf32>
    %cst_7 = arith.constant dense<0.000000e+00> : vector<8x8xf32>
    %9 = tpu.matmul %5, %7, %cst_7 {dimension_numbers = #tpu.dot_dimension_numbers<[1], [1], [0], [0], [0, 0, 1, 0], [], []>} : vector<8x32xf32>, vector<8x32xf32>, vector<8x8xf32> -> vector<8x8xf32>
    %c8_i32 = arith.constant 8 : i32
    %10 = arith.muli %arg0, %c8_i32 : i32
    %11 = tpu.iota {dimensions = array<i32: 0>} : vector<8x8xi32>
    %12 = vector.broadcast %10 : i32 to vector<8x8xi32>
    %13 = arith.addi %12, %11 : vector<8x8xi32>
    %c8_i32_8 = arith.constant 8 : i32
    %14 = arith.muli %arg1, %c8_i32_8 : i32
    %15 = tpu.iota {dimensions = array<i32: 1>} : vector<8x8xi32>
    %16 = vector.broadcast %14 : i32 to vector<8x8xi32>
    %17 = arith.addi %16, %15 : vector<8x8xi32>
    %18 = arith.cmpi eq, %13, %17 : vector<8x8xi32>
    %cst_9 = arith.constant 1.1920929E-7 : f32
    %cst_10 = arith.constant 0.000000e+00 : f32
    %19 = vector.broadcast %cst_9 : f32 to vector<8x8xf32>
    %20 = vector.broadcast %cst_10 : f32 to vector<8x8xf32>
    %21 = arith.select %18, %19, %20 : vector<8x8xi1>, vector<8x8xf32>
    %22 = arith.addf %8, %21 : vector<8x8xf32>
    %23 = arith.addf %9, %21 : vector<8x8xf32>
    %cst_11 = arith.constant dense<0xFF800000> : vector<8xf32>
    %24 = vector.multi_reduction <maximumf>, %22, %cst_11 [1] : vector<8x8xf32> to vector<8xf32>
    %25 = vector.shape_cast %24 : vector<8xf32> to vector<8x1xf32>
    %cst_12 = arith.constant dense<0xFF800000> : vector<8xf32>
    %26 = vector.multi_reduction <maximumf>, %23, %cst_12 [1] : vector<8x8xf32> to vector<8xf32>
    %27 = vector.shape_cast %26 : vector<8xf32> to vector<8x1xf32>
    %28 = arith.maximumf %25, %27 : vector<8x1xf32>
    %c0_13 = arith.constant 0 : index
    %c0_14 = arith.constant 0 : index
    %29 = vector.load %arg7[%c0_13, %c0_14] : memref<8x1xf32, #tpu.memory_space<vmem>>, vector<8x1xf32>
    %30 = arith.maximumf %29, %28 : vector<8x1xf32>
    %31 = arith.subf %29, %30 : vector<8x1xf32>
    %32 = math.exp %31 : vector<8x1xf32>
    %33 = vector.broadcast %30 : vector<8x1xf32> to vector<8x8xf32>
    %34 = arith.subf %22, %33 : vector<8x8xf32>
    %35 = math.exp %34 : vector<8x8xf32>
    %cst_15 = arith.constant dense<0.000000e+00> : vector<8xf32>
    %36 = vector.multi_reduction <add>, %35, %cst_15 [1] : vector<8x8xf32> to vector<8xf32>
    %37 = vector.shape_cast %36 : vector<8xf32> to vector<8x1xf32>
    %38 = vector.broadcast %30 : vector<8x1xf32> to vector<8x8xf32>
    %39 = arith.subf %23, %38 : vector<8x8xf32>
    %40 = math.exp %39 : vector<8x8xf32>
    %cst_16 = arith.constant dense<0.000000e+00> : vector<8xf32>
    %41 = vector.multi_reduction <add>, %40, %cst_16 [1] : vector<8x8xf32> to vector<8xf32>
    %42 = vector.shape_cast %41 : vector<8xf32> to vector<8x1xf32>
    %43 = arith.addf %37, %42 : vector<8x1xf32>
    %c0_17 = arith.constant 0 : index
    %c0_18 = arith.constant 0 : index
    %44 = vector.load %arg8[%c0_17, %c0_18] : memref<8x1xf32, #tpu.memory_space<vmem>>, vector<8x1xf32>
    %45 = arith.mulf %32, %44 : vector<8x1xf32>
    %46 = arith.addf %45, %43 : vector<8x1xf32>
    %c0_19 = arith.constant 0 : index
    %c0_20 = arith.constant 0 : index
    %47 = vector.load %arg8[%c0_19, %c0_20] : memref<8x1xf32, #tpu.memory_space<vmem>>, vector<8x1xf32>
    tpu.vector_store %arg8[%c0_19, %c0_20], %46 {strides = array<i32>} : memref<8x1xf32, #tpu.memory_space<vmem>>, vector<8x1xf32>,
    %c0_21 = arith.constant 0 : index
    %c0_22 = arith.constant 0 : index
    %48 = vector.load %arg7[%c0_21, %c0_22] : memref<8x1xf32, #tpu.memory_space<vmem>>, vector<8x1xf32>
    tpu.vector_store %arg7[%c0_21, %c0_22], %30 {strides = array<i32>} : memref<8x1xf32, #tpu.memory_space<vmem>>, vector<8x1xf32>,
    %c0_i32_23 = arith.constant 0 : i32
    %49 = arith.cmpi eq, %arg1, %c0_i32_23 : i32
    %50 = arith.extui %49 : i1 to i32
    %c0_i32_24 = arith.constant 0 : i32
    %51 = arith.cmpi ne, %50, %c0_i32_24 : i32
    scf.if %51 {
      %c0_25 = arith.constant 0 : index
      %c0_26 = arith.constant 0 : index
      %52 = vector.load %arg3[%c0_25, %c0_26] : memref<8x32xf32, #tpu.memory_space<vmem>>, vector<8x32xf32>
      %53 = arith.mulf %5, %52 : vector<8x32xf32>
      %cst_27 = arith.constant dense<0.000000e+00> : vector<8xf32>
      %54 = vector.multi_reduction <add>, %53, %cst_27 [1] : vector<8x32xf32> to vector<8xf32>
      %55 = vector.shape_cast %54 : vector<8xf32> to vector<8x1xf32>
      %cst_28 = arith.constant 0.000000e+00 : f32
      %56 = vector.broadcast %cst_28 : f32 to vector<8x1xf32>
      %57 = arith.subf %56, %55 : vector<8x1xf32>
      %c0_29 = arith.constant 0 : index
      %c0_30 = arith.constant 0 : index
      %58 = vector.load %arg8[%c0_29, %c0_30] : memref<8x1xf32, #tpu.memory_space<vmem>>, vector<8x1xf32>
      %59 = math.log %58 : vector<8x1xf32>
      %60 = arith.addf %57, %59 : vector<8x1xf32>
      %c0_31 = arith.constant 0 : index
      %c0_32 = arith.constant 0 : index
      %61 = vector.load %arg7[%c0_31, %c0_32] : memref<8x1xf32, #tpu.memory_space<vmem>>, vector<8x1xf32>
      %62 = arith.addf %60, %61 : vector<8x1xf32>
      %c0_33 = arith.constant 0 : index
      %c0_34 = arith.constant 0 : index
      %63 = vector.load %arg6[%c0_33, %c0_34] : memref<8x1xf32, #tpu.memory_space<vmem>>, vector<8x1xf32>
      tpu.vector_store %arg6[%c0_33, %c0_34], %62 {strides = array<i32>} : memref<8x1xf32, #tpu.memory_space<vmem>>, vector<8x1xf32>,
    } else {
    }
    return
  }
  func.func @transform_0(%arg0: i32, %arg1: i32) -> (i32, i32) {
    %c0_i32 = arith.constant 0 : i32
    %c0_i32_0 = arith.constant 0 : i32
    return %arg0, %c0_i32 : i32, i32
  }
  func.func @transform_1(%arg0: i32, %arg1: i32) -> (i32, i32) {
    %c0_i32 = arith.constant 0 : i32
    %c0_i32_0 = arith.constant 0 : i32
    return %arg0, %c0_i32 : i32, i32
  }
  func.func @transform_2(%arg0: i32, %arg1: i32) -> (i32, i32) {
    %c0_i32 = arith.constant 0 : i32
    %c0_i32_0 = arith.constant 0 : i32
    return %arg1, %c0_i32 : i32, i32
  }
  func.func @transform_3(%arg0: i32, %arg1: i32) -> (i32, i32) {
    %c0_i32 = arith.constant 0 : i32
    %c0_i32_0 = arith.constant 0 : i32
    return %arg1, %c0_i32 : i32, i32
  }
  func.func @transform_4(%arg0: i32, %arg1: i32) -> (i32, i32) {
    %c0_i32 = arith.constant 0 : i32
    %c0_i32_0 = arith.constant 0 : i32
    return %arg0, %c0_i32 : i32, i32
  }
}

</mosaic_0001>

<bundles_post_ra>
// kernel: tpu_custom_call.1
= control target key start
LH: loop header
LB: loop body
LE: loop exit
PB: predicated region body
PF: predicated region fallthrough
CT: control target
= control target key end

     0   :  { %9 = vsyncpa [#allocation5], 0  ;;  %s477_s0 = inlined_call_operand.hbm [shape: f32[8,32], index: 0, kind: input, shape index: {}]   ;;  %s478_s1 = inlined_call_operand.hbm [shape: f32[8,32], index: 1, kind: input, shape index: {}]   ;;  %s479_s2 = inlined_call_operand.hbm [shape: f32[8,32], index: 2, kind: input, shape index: {}]   ;;  %s480_s3 = inlined_call_operand.vmem [shape: f32[8,32], index: 3, kind: input, shape index: {}]   ;;  %s481_s4 = inlined_call_operand.vmem [shape: f32[8,1], index: 4, kind: output, shape index: {}]  }
   0x1   :  { %10 = vsyncpa [#allocation7], 0  ;;  %s389_s15 = smov [#allocation6]   ;;  %s390_s17 = smov [#allocation4]  }
   0x2   :  { %s27_s16 = sshll.u32 %s389_s15, 4  ;;  %s17_s18 = sshll.u32 %s390_s17, 4  ;;  %s28_s16 = int_to_ptr.vmem [resolvable:$true] %s27_s16  ;;  %s18_s18 = int_to_ptr.vmem [resolvable:$true] %s17_s18 }
   0x3   :  { %s319_s21 = scalar_lea.hbm %s478_s1, 128 }
   0x4   :  { %p320_p0 = scmp.ne.s32.totalorder %s478_s1, %s319_s21  ;;  %p323_p1 = scmp.lt.u32.totalorder %s319_s21, %s478_s1 }
   0x6   :  { %p325_p2 = pnand %p323_p1, %p320_p0 }
   0x8   :  { %328 = shalt.err (!%p325_p2)
}
   0x9   :  { %s329_s26 = scalar_lea.vmem %s28_s16, 128  ;;  %p334_p4 = scmp.lt.s32.totalorder %s28_s16, %s28_s16 }
   0xa   :  { %p330_p3 = scmp.ne.s32.totalorder %s28_s16, %s329_s26  ;;  %p335_p5 = scmp.lt.s32.totalorder %s329_s26, %s329_s26 }
   0xc   :  { %p336_p6 = por %p335_p5, %p334_p4 }
   0xe   :  { %p337_p7 = pnand %p336_p6, %p330_p3 }
  0x10   :  { %340 = shalt.err (!%p337_p7)
}
  0x11   :  { %30 = dma.hbm_to_vmem [thread:$0]  %s478_s1, 128, %s28_s16, [#allocation7]  }
  0x12   :  { %s341_s5 = scalar_lea.hbm %s477_s0, 128 }
  0x13   :  { %p342_p8 = scmp.ne.s32.totalorder %s477_s0, %s341_s5  ;;  %p345_p9 = scmp.lt.u32.totalorder %s341_s5, %s477_s0 }
  0x15   :  { %p347_p10 = pnand %p345_p9, %p342_p8 }
  0x17   :  { %350 = shalt.err (!%p347_p10)
}
  0x18   :  { %s351_s10 = scalar_lea.vmem %s18_s18, 128  ;;  %p356_p12 = scmp.lt.s32.totalorder %s18_s18, %s18_s18 }
  0x19   :  { %p352_p11 = scmp.ne.s32.totalorder %s18_s18, %s351_s10  ;;  %p357_p13 = scmp.lt.s32.totalorder %s351_s10, %s351_s10 }
  0x1b   :  { %p358_p0 = por %p357_p13, %p356_p12 }
  0x1d   :  { %p359_p1 = pnand %p358_p0, %p352_p11 }
  0x1f   :  { %362 = shalt.err (!%p359_p1)
}
  0x20   :  { %20 = dma.hbm_to_vmem [thread:$0]  %s477_s0, 128, %s18_s18, [#allocation5]  }
  0x21   :  { %s391_s12 = smov [#allocation8]   ;;  %s363_s16 = scalar_lea.hbm %s479_s2, 128 }
  0x22   :  { %s37_s13 = sshll.u32 %s391_s12, 4  ;;  %p364_p2 = scmp.ne.s32.totalorder %s479_s2, %s363_s16  ;;  %s38_s13 = int_to_ptr.vmem [resolvable:$true] %s37_s13 }
  0x23   :  { %p367_p3 = scmp.lt.u32.totalorder %s363_s16, %s479_s2 }
  0x25   :  { %p369_p4 = pnand %p367_p3, %p364_p2 }
  0x27   :  { %372 = shalt.err (!%p369_p4)
}
  0x28   :  { %s373_s22 = scalar_lea.vmem %s38_s13, 128  ;;  %p378_p6 = scmp.lt.s32.totalorder %s38_s13, %s38_s13 }
  0x29   :  { %p374_p5 = scmp.ne.s32.totalorder %s38_s13, %s373_s22  ;;  %p379_p7 = scmp.lt.s32.totalorder %s373_s22, %s373_s22 }
  0x2b   :  { %p380_p8 = por %p379_p7, %p378_p6 }
  0x2d   :  { %p381_p9 = pnand %p380_p8, %p374_p5 }
  0x2f   :  { %384 = shalt.err (!%p381_p9)
}
  0x30   :  { %40 = dma.hbm_to_vmem [thread:$0]  %s479_s2, 128, %s38_s13, [#allocation7]  }
  0x31   :  { %385 = dma.done.wait [#allocation5], 128  }
  0x32   :  { %386 = vsyncadd [#allocation5], 4294967168 }
  0x33   :  { %387 = dma.done.wait [#allocation7], 256  }
  0x34   :  { %388 = vsyncadd [#allocation7], 4294967040  ;;  %v392_v0 = vmov 0.0   ;;  %vm393_vm0 = vmmov 0   ;;  %vm75_vm1 = vcmask 261120   ;;  %v61_v1 = vld [vmem:[#allocation8] sm:$0xff]  ;;  %v64_v5 = vlaneseq }
  0x35   :  { %292 = vmatprep.subr.mxu0 %v392_v0  ;;  %294 = vmatprep.mubr.msk.f32.mxu0 %vm393_vm0, %v392_v0  ;;  %v59_v2 = vld [vmem:[#allocation4] sm:$0xff]  ;;  %v62_v3 = vld [vmem:[%s480_s3] sm:$0xff]  ;;  %vm225_vm3 = vcmask 64512   ;;  %vm56_vm4 = vcmask 7168   ;;  %v394_v17 = vmov -inf   ;;  %v395_v18 = vmov 0  }
  0x36   :  { %297 = vmatprep.subr.mxu1 %v392_v0  ;;  %299 = vmatprep.mubr.msk.f32.mxu1 %vm393_vm0, %v392_v0  ;;  %v60_v4 = vmul.f32 10.0, %v59_v2  ;;  %v65_v6 = vshrl.u32 %v64_v5, 7  ;;  %v70_v7 = vand.u32 127, %v64_v5  ;;  %57 = vst.msk [vmem:[#allocation2] sm:$0xff] %vm56_vm4, %v394_v17  ;;  %58 = vst.msk [vmem:[#allocation3] sm:$0xff] %vm56_vm4, %v392_v0  ;;  %v265_v30 = vld [vmem:[#allocation6] sm:$0xff] }
  0x37   :  { %293 = vmatpush3.xpose.msk.msra.mxu0 %vm75_vm1, %v61_v1  ;;  %298 = vmatpush3.xpose.msk.msra.mxu1 %vm75_vm1, %v62_v3 }
  0x38   :  { %vm73_vm2 = vcmp.eq.s32.totalorder %v65_v6, %v70_v7  ;;  %309 = vset.pattern.permute.xlu1 %v395_v18  ;;  %310 = vset.pattern.permute.xlu0 %v395_v18  ;;  %v266_v32 = vmul.f32 %v265_v30, %v60_v4 }
  0x39   :  { %v74_v8 = vsel %vm73_vm2, 1.1920929e-07, %v392_v0 }
  0x3a   :  { %295 = vmatmul.mubr.msk.f32.vlgmr.msra.gmra.mrb[0].mxu0 %vm75_vm1, %v60_v4  ;;  %300 = vmatmul.mubr.msk.f32.vlgmr.msra.gmra.mrb[0].mxu1 %vm75_vm1, %v60_v4  ;;  %v267_v36 = vsel %vm75_vm1, %v266_v32, 0.0 }
  0x3d   :  { %v233_v21 = vld [vmem:[#allocation2] sm:$0xff]  ;;  %v256_v39 = vld [vmem:[#allocation3] sm:$0xff] }
 0x10d   :  { %v148_v9 = vpop.f32.mrb[0].mxu0  ;;  %v221_v10 = vpop.f32.mrb[0].mxu1 }
 0x10e   :  { %v149_v11 = vadd.f32 %v148_v9, %v74_v8  ;;  %v296_v12 = vpop.f32.mrb[1].mxu0  ;;  %v222_v13 = vadd.f32 %v221_v10, %v74_v8  ;;  %v301_v14 = vpop.f32.mrb[1].mxu1 }
 0x110   :  { %v226_v15 = vsel %vm225_vm3, %v149_v11, -inf  ;;  %v229_v16 = vsel %vm225_vm3, %v222_v13, -inf }
 0x111   :  { %227 = vmax.xlane.f32.xlu0 %v226_v15 }
 0x115   :  { %230 = vmax.xlane.f32.xlu0 %v229_v16 }
 0x19e   :  { %v228_v19 = vpop.xlane.xlu0 %227 }
 0x1a2   :  { %v231_v20 = vpop.xlane.xlu0 %230 }
 0x1a3   :  { %v232_v22 = vmax.f32 %v228_v19, %v231_v20 }
 0x1a5   :  { %v234_v23 = vmax.f32 %v233_v21, %v232_v22 }
 0x1a7   :  { %v235_v24 = vsub.f32 %v233_v21, %v234_v23  ;;  %261 = vst.msk [vmem:[#allocation2] sm:$0xff] %vm56_vm4, %v234_v23  ;;  %240 = vperm.xlu1 %309, %v234_v23  }
 0x1a9   :  { %v236_v37 = vmul.f32 1.442695, %v235_v24 }
 0x1ae   :  { %v275_v51 = vld [vmem:[#allocation2] sm:$0xff] }
 0x226   :  { %v241_v25 = vpop.permute.xlu1 %240 }
 0x227   :  { %v243_v26 = vsub.f32 %v149_v11, %v241_v25  ;;  %v249_v27 = vsub.f32 %v222_v13, %v241_v25 }
 0x229   :  { %v244_v28 = vmul.f32 1.442695, %v243_v26  ;;  %v250_v29 = vmul.f32 1.442695, %v249_v27 }
 0x22b   :  { %311 = vpow2.f32 %v244_v28 }
 0x22c   :  { %313 = vpow2.f32 %v250_v29 }
 0x22d   :  { %315 = vpow2.f32 %v236_v37 }
 0x235   :  { %v312_v31 = vpop.eup %311 }
 0x236   :  { %v314_v33 = vpop.eup %313  ;;  %v246_v34 = vsel %vm225_vm3, %v312_v31, 0.0 }
 0x237   :  { %v252_v35 = vsel %vm225_vm3, %v314_v33, 0.0  ;;  %247 = vadd.xlane.f32.xlu1 %v246_v34  ;;  %v316_v38 = vpop.eup %315 }
 0x238   :  { %253 = vadd.xlane.f32.xlu0 %v252_v35  ;;  %v257_v43 = vmul.f32 %v316_v38, %v256_v39 }
 0x23c   :  { %268 = vadd.xlane.f32.xlu0 %v267_v36 }
 0x2c4   :  { %v248_v40 = vpop.xlane.xlu1 %247 }
 0x2c5   :  { %v254_v41 = vpop.xlane.xlu0 %253 }
 0x2c6   :  { %v255_v42 = vadd.f32 %v254_v41, %v248_v40 }
 0x2c8   :  { %v258_v44 = vadd.f32 %v257_v43, %v255_v42 }
 0x2c9   :  { %v269_v46 = vpop.xlane.xlu0 %268 }
 0x2ca   :  { %260 = vst.msk [vmem:[#allocation3] sm:$0xff] %vm56_vm4, %v258_v44  ;;  %v270_v47 = vsub.f32 0.0, %v269_v46 }
 0x2d1   :  { %v271_v45 = vld [vmem:[#allocation3] sm:$0xff] }
 0x2d2   :  { %317 = vlog2.f32 %v271_v45 }
 0x2dc   :  { %v318_v48 = vpop.eup %317 }
 0x2dd   :  { %v273_v49 = vmul.f32 0.6931472, %v318_v48 }
 0x2df   :  { %v274_v50 = vadd.f32 %v273_v49, %v270_v47 }
 0x2e1   :  { %v276_v52 = vadd.f32 %v275_v51, %v274_v50 }
 0x2e3   :  { %277 = vst.msk [vmem:[%s481_s4] sm:$0xff] %vm56_vm4, %v276_v52 }
 0x2e4   :  { %282 = vsyncpa [#allocation5], 1 }
 0x2e5   :  { %283 = vsyncpa [#allocation7], 1 }

</bundles_post_ra>
